<compile_context>
chip_gen: v7x
topology: tpu7x:2x2x1
jax: 0.10.0
libtpu: 0.0.40
codegen_flags: <defaults>
</compile_context>

<pallas_src>
import functools

import jax
import jax.numpy as jnp
from jax.experimental import pallas as pl
from jax.experimental.pallas import tpu as pltpu

ENCODING_DIM = 256
HIDDEN = 128
RAW_OUT = 4            # network output width before the bound transform
OUT_PAD = 128          # lane-dense padded output width (multiple of 128)
STATE_DIM = 3          # (x, y, theta) produced by forward()

_MAX_TILE_ROWS = 1024        # per-grid-step overhead amortization (review item)
_MIN_SPLIT_TILE_ROWS = 256   # never split below this many rows per TensorCore


def _round_up(x, m):
    return ((x + m - 1) // m) * m


def _num_tensorcores():
    """Best-effort: v7x packs 2 TensorCores per chip; v5e/v6e have 1."""
    try:
        kind = jax.devices()[0].device_kind.lower()
        return 2 if "v7" in kind else 1
    except Exception:  # pragma: no cover - defensive
        return 1


_NUM_TC = _num_tensorcores()


def _proposer_mlp_kernel(bounds_ref,
                         x_ref,
                         w1_ref, b1_ref,
                         w2_ref, b2_ref,
                         w3_ref, b3_ref,
                         w4_ref, b4_ref,
                         w5_ref, b5_ref,
                         out_ref):
    """One row tile: 5x (matmul + bias), 4x ReLU, tanh, fused x/y bound rescale.

    MXU operands are bf16 (weights prepared once, x cast in-kernel); bias add,
    ReLU, tanh and the bound transform stay f32 on the VPU/EUP.
    bounds_ref (SMEM, f32[4]) = [range_x/2, range_y/2, mid_x, mid_y].
    """
    cd = w1_ref.dtype  # compute dtype for MXU operands (bf16)

    # In-kernel f32 -> bf16 cast (perf review: no wrapper cast pass).
    x = x_ref[...].astype(cd)

    h = jnp.dot(x, w1_ref[...], preferred_element_type=jnp.float32) + b1_ref[...]
    h = jnp.maximum(h, 0.0).astype(cd)
    # nn.Dropout(p=1-keep_ratio): identity at inference (keep_ratio = 1.0)

    h = jnp.dot(h, w2_ref[...], preferred_element_type=jnp.float32) + b2_ref[...]
    h = jnp.maximum(h, 0.0).astype(cd)

    h = jnp.dot(h, w3_ref[...], preferred_element_type=jnp.float32) + b3_ref[...]
    h = jnp.maximum(h, 0.0).astype(cd)

    h = jnp.dot(h, w4_ref[...], preferred_element_type=jnp.float32) + b4_ref[...]
    h = jnp.maximum(h, 0.0).astype(cd)

    o = jnp.dot(h, w5_ref[...], preferred_element_type=jnp.float32) + b5_ref[...]
    o = jnp.tanh(o)

    # Fused bound transform built from SMEM scalars:
    #   col 0: tanh * range_x/2 + mid_x      col 1: tanh * range_y/2 + mid_y
    #   cols 2/3: pass-through (feed atan2 in glue)
    #   cols 4..127: zero-padded lanes stay zero (w5 pad is zero -> tanh(0)=0).
    col = jax.lax.broadcasted_iota(jnp.int32, (1, OUT_PAD), 1)
    scale = jnp.where(col == 0, bounds_ref[0],
                      jnp.where(col == 1, bounds_ref[1], 1.0))
    shift = jnp.where(col == 0, bounds_ref[2],
                      jnp.where(col == 1, bounds_ref[3], 0.0))

    out_ref[...] = (o * scale + shift).astype(out_ref.dtype)


def _choose_tile_rows(n, max_tile_rows):
    """Row-tile selection: biggest tile that fits, >=2 grid steps on v7x."""
    tile_cap = max_tile_rows
    if _NUM_TC >= 2 and n > 2 * _MIN_SPLIT_TILE_ROWS:
        half = _round_up(-(-n // 2), 16)
        tile_cap = min(tile_cap, max(_MIN_SPLIT_TILE_ROWS, half))
    if n <= tile_cap:
        # Single block that exactly matches the array extent (always legal,
        # no padding, no masked last block).
        return n
    return tile_cap


def _run_mlp(x, prepared_params, bounds, *, max_tile_rows=_MAX_TILE_ROWS):
    """x: [N, 256] (f32 or bf16) -> lane-dense kernel output [N, OUT_PAD]."""
    n, e = x.shape
    assert e == ENCODING_DIM
    out_dtype = x.dtype

    w1, b1, w2, b2, w3, b3, w4, b4, w5p, b5p = prepared_params

    tile_rows = _choose_tile_rows(n, max_tile_rows)
    grid = (pl.cdiv(n, tile_rows),)

    row_map = lambda i: (i, 0)
    rep_map = lambda i: (0, 0)
    full = lambda shape: pl.BlockSpec(shape, rep_map)

    out = pl.pallas_call(
        _proposer_mlp_kernel,
        out_shape=jax.ShapeDtypeStruct((n, OUT_PAD), out_dtype),
        grid_spec=pltpu.PrefetchScalarGridSpec(
            num_scalar_prefetch=0,
            grid=grid,
            in_specs=[
                # 4 bound scalars live in SMEM (no VMEM vectors / extra DMAs).
                pl.BlockSpec(memory_space=pltpu.MemorySpace.SMEM),
                pl.BlockSpec((tile_rows, ENCODING_DIM), row_map),
                full((ENCODING_DIM, HIDDEN)), full((1, HIDDEN)),
                full((HIDDEN, HIDDEN)), full((1, HIDDEN)),
                full((HIDDEN, HIDDEN)), full((1, HIDDEN)),
                full((HIDDEN, HIDDEN)), full((1, HIDDEN)),
                full((HIDDEN, OUT_PAD)), full((1, OUT_PAD)),
            ],
            out_specs=pl.BlockSpec((tile_rows, OUT_PAD), row_map),
        ),
        compiler_params=pltpu.CompilerParams(
            dimension_semantics=("parallel",)),
    )(bounds, x, w1, b1, w2, b2, w3, b3, w4, b4, w5p, b5p)

    return out


def init_proposer_params(key, dtype=jnp.float32):
    """Deterministic init matching the nn.Linear shapes (stored as [in, out])."""
    dims = [(ENCODING_DIM, HIDDEN), (HIDDEN, HIDDEN), (HIDDEN, HIDDEN),
            (HIDDEN, HIDDEN), (HIDDEN, RAW_OUT)]
    params = []
    for (fan_in, fan_out) in dims:
        key, kw, kb = jax.random.split(key, 3)
        bound = 1.0 / jnp.sqrt(jnp.array(fan_in, dtype))
        w = jax.random.uniform(kw, (fan_in, fan_out), dtype, -bound, bound)
        b = jax.random.uniform(kb, (1, fan_out), dtype, -bound, bound)
        params.append((w, b))
    return params


def prepare_params(params, compute_dtype=jnp.bfloat16):
    """One-time kernel-operand preparation (hoisted out of the forward pass).

    Casts w1..w5 to bf16 for the MXU, keeps biases in f32, and zero-pads the
    final Linear from 4 -> OUT_PAD output columns so the kernel's stores are
    unmasked full-lane vst.  Call this once; reuse the result for every call.
    """
    (w1, b1), (w2, b2), (w3, b3), (w4, b4), (w5, b5) = params
    cw = lambda w: jnp.asarray(w, compute_dtype)
    cb = lambda b: jnp.asarray(b, jnp.float32).reshape(1, -1)

    w5p = jnp.zeros((HIDDEN, OUT_PAD), compute_dtype).at[:, :RAW_OUT].set(
        jnp.asarray(w5, compute_dtype))
    b5p = jnp.zeros((1, OUT_PAD), jnp.float32).at[:, :RAW_OUT].set(
        jnp.asarray(b5, jnp.float32).reshape(1, -1))

    return (cw(w1), cb(b1), cw(w2), cb(b2), cw(w3), cb(b3), cw(w4), cb(b4),
            w5p, b5p)


@functools.partial(jax.jit, static_argnames=("num_particles",))
def proposer_forward(encoding, num_particles, state_mins_t, state_maxs_t,
                     prepared_params):
    """
    encoding:        [B, 256]
    num_particles:   int (static)
    state_mins_t:    [state_dim]
    state_maxs_t:    [state_dim]
    prepared_params: output of prepare_params()
    returns:         [B, num_particles, 3]
    """
    b, e = encoding.shape
    p = num_particles
    dtype = encoding.dtype
    if b == 0 or p == 0:
        return jnp.empty((b, p, STATE_DIM), dtype=dtype)

    f32 = jnp.float32
    mins = state_mins_t.astype(f32)
    maxs = state_maxs_t.astype(f32)
    # [range_x/2, range_y/2, mid_x, mid_y] -> SMEM scalars for the kernel.
    bounds = jnp.stack([
        (maxs[0] - mins[0]) * 0.5,
        (maxs[1] - mins[1]) * 0.5,
        (maxs[0] + mins[0]) * 0.5,
        (maxs[1] + mins[1]) * 0.5,
    ])

    # Dropout is identity at inference, so every particle of a batch row gets
    # an identical proposal: run the MLP once per batch row and broadcast over
    # the particle axis (exactly matches the reference output).
    raw = _run_mlp(encoding, prepared_params, bounds)  # [B, OUT_PAD]

    part0 = raw[:, 0:1]                                # rescaled in-kernel
    part1 = raw[:, 1:2]
    # TODO(synk): atan2 kept in JAX glue (no guaranteed Mosaic lowering for lax.atan2).
    part2 = jnp.arctan2(raw[:, 2:3], raw[:, 3:4])
    per_row = jnp.concatenate([part0, part1, part2], axis=-1).astype(dtype)

    return jnp.broadcast_to(per_row[:, None, :], (b, p, STATE_DIM))


if __name__ == "__main__":
    key = jax.random.PRNGKey(0)
    k_enc, k_par = jax.random.split(key)

    B = 2
    NUM_PARTICLES = 8

    encoding = jax.random.normal(k_enc, (B, ENCODING_DIM), jnp.float32)
    state_mins_t = jnp.array([-1.0, -2.0, -jnp.pi], jnp.float32)
    state_maxs_t = jnp.array([3.0, 2.0, jnp.pi], jnp.float32)

    params = init_proposer_params(k_par)
    prepared = prepare_params(params)   # one-time weight prep (hoisted)

    out = proposer_forward(encoding, NUM_PARTICLES, state_mins_t, state_maxs_t,
                           prepared)
    out = jax.block_until_ready(out)

    assert out.shape == (B, NUM_PARTICLES, STATE_DIM), out.shape
    assert out.dtype == jnp.float32
    assert bool(jnp.all(jnp.isfinite(out)))
    # All particles in a batch row must be identical (dropout is identity).
    assert bool(jnp.all(out[:, :1, :] == out))
    # x/y must respect the bound transform (tanh in [-1,1] -> [min, max]).
    assert bool(jnp.all(out[..., 0] >= state_mins_t[0] - 1e-3))
    assert bool(jnp.all(out[..., 0] <= state_maxs_t[0] + 1e-3))
    assert bool(jnp.all(out[..., 1] >= state_mins_t[1] - 1e-3))
    assert bool(jnp.all(out[..., 1] <= state_maxs_t[1] + 1e-3))

    print("KERNEL_OK")
</pallas_src>

<mosaic_0001>
module attributes {stable_mosaic.version = 11 : i64} {
  func.func @_proposer_mlp_kernel(%arg0: i32, %arg1: memref<4xf32, #tpu.memory_space<smem>>, %arg2: memref<2x256xf32, #tpu.memory_space<vmem>>, %arg3: memref<256x128xbf16, #tpu.memory_space<vmem>>, %arg4: memref<1x128xf32, #tpu.memory_space<vmem>>, %arg5: memref<128x128xbf16, #tpu.memory_space<vmem>>, %arg6: memref<1x128xf32, #tpu.memory_space<vmem>>, %arg7: memref<128x128xbf16, #tpu.memory_space<vmem>>, %arg8: memref<1x128xf32, #tpu.memory_space<vmem>>, %arg9: memref<128x128xbf16, #tpu.memory_space<vmem>>, %arg10: memref<1x128xf32, #tpu.memory_space<vmem>>, %arg11: memref<128x128xbf16, #tpu.memory_space<vmem>>, %arg12: memref<1x128xf32, #tpu.memory_space<vmem>>, %arg13: memref<2x128xf32, #tpu.memory_space<vmem>>) attributes {dimension_semantics = [#tpu.dimension_semantics<parallel>], iteration_bounds = array<i64: 1>, scalar_prefetch = 0 : i64, scratch_operands = 0 : i64, tpu.core_type = #tpu.core_type<tc>, window_params = [{transform_indices = @transform_0, window_bounds = array<i64: 4>}, {transform_indices = @transform_1, window_bounds = array<i64: 2, 256>}, {pipeline_mode = #tpu.pipeline_mode<synchronous>, transform_indices = @transform_2, window_bounds = array<i64: 256, 128>}, {pipeline_mode = #tpu.pipeline_mode<synchronous>, transform_indices = @transform_3, window_bounds = array<i64: 1, 128>}, {pipeline_mode = #tpu.pipeline_mode<synchronous>, transform_indices = @transform_4, window_bounds = array<i64: 128, 128>}, {pipeline_mode = #tpu.pipeline_mode<synchronous>, transform_indices = @transform_5, window_bounds = array<i64: 1, 128>}, {pipeline_mode = #tpu.pipeline_mode<synchronous>, transform_indices = @transform_6, window_bounds = array<i64: 128, 128>}, {pipeline_mode = #tpu.pipeline_mode<synchronous>, transform_indices = @transform_7, window_bounds = array<i64: 1, 128>}, {pipeline_mode = #tpu.pipeline_mode<synchronous>, transform_indices = @transform_8, window_bounds = array<i64: 128, 128>}, {pipeline_mode = #tpu.pipeline_mode<synchronous>, transform_indices = @transform_9, window_bounds = array<i64: 1, 128>}, {pipeline_mode = #tpu.pipeline_mode<synchronous>, transform_indices = @transform_10, window_bounds = array<i64: 128, 128>}, {pipeline_mode = #tpu.pipeline_mode<synchronous>, transform_indices = @transform_11, window_bounds = array<i64: 1, 128>}, {transform_indices = @transform_12, window_bounds = array<i64: 2, 128>}]} {
    %c0 = arith.constant 0 : index
    %c0_0 = arith.constant 0 : index
    %0 = vector.load %arg2[%c0, %c0_0] : memref<2x256xf32, #tpu.memory_space<vmem>>, vector<2x256xf32>
    %1 = arith.truncf %0 : vector<2x256xf32> to vector<2x256xbf16>
    %c0_1 = arith.constant 0 : index
    %c0_2 = arith.constant 0 : index
    %2 = vector.load %arg3[%c0_1, %c0_2] : memref<256x128xbf16, #tpu.memory_space<vmem>>, vector<256x128xbf16>
    %cst = arith.constant dense<0.000000e+00> : vector<2x128xf32>
    %3 = tpu.matmul %1, %2, %cst {dimension_numbers = #tpu.dot_dimension_numbers<[1], [0], [0], [1], [0, 0, 1, 1], [], []>} : vector<2x256xbf16>, vector<256x128xbf16>, vector<2x128xf32> -> vector<2x128xf32>
    %c0_3 = arith.constant 0 : index
    %c0_4 = arith.constant 0 : index
    %4 = vector.load %arg4[%c0_3, %c0_4] : memref<1x128xf32, #tpu.memory_space<vmem>>, vector<1x128xf32>
    %5 = vector.broadcast %4 : vector<1x128xf32> to vector<2x128xf32>
    %6 = arith.addf %3, %5 : vector<2x128xf32>
    %cst_5 = arith.constant 0.000000e+00 : f32
    %7 = vector.broadcast %cst_5 : f32 to vector<2x128xf32>
    %8 = arith.maximumf %6, %7 : vector<2x128xf32>
    %9 = arith.truncf %8 : vector<2x128xf32> to vector<2x128xbf16>
    %c0_6 = arith.constant 0 : index
    %c0_7 = arith.constant 0 : index
    %10 = vector.load %arg5[%c0_6, %c0_7] : memref<128x128xbf16, #tpu.memory_space<vmem>>, vector<128x128xbf16>
    %cst_8 = arith.constant dense<0.000000e+00> : vector<2x128xf32>
    %11 = tpu.matmul %9, %10, %cst_8 {dimension_numbers = #tpu.dot_dimension_numbers<[1], [0], [0], [1], [0, 0, 1, 1], [], []>} : vector<2x128xbf16>, vector<128x128xbf16>, vector<2x128xf32> -> vector<2x128xf32>
    %c0_9 = arith.constant 0 : index
    %c0_10 = arith.constant 0 : index
    %12 = vector.load %arg6[%c0_9, %c0_10] : memref<1x128xf32, #tpu.memory_space<vmem>>, vector<1x128xf32>
    %13 = vector.broadcast %12 : vector<1x128xf32> to vector<2x128xf32>
    %14 = arith.addf %11, %13 : vector<2x128xf32>
    %cst_11 = arith.constant 0.000000e+00 : f32
    %15 = vector.broadcast %cst_11 : f32 to vector<2x128xf32>
    %16 = arith.maximumf %14, %15 : vector<2x128xf32>
    %17 = arith.truncf %16 : vector<2x128xf32> to vector<2x128xbf16>
    %c0_12 = arith.constant 0 : index
    %c0_13 = arith.constant 0 : index
    %18 = vector.load %arg7[%c0_12, %c0_13] : memref<128x128xbf16, #tpu.memory_space<vmem>>, vector<128x128xbf16>
    %cst_14 = arith.constant dense<0.000000e+00> : vector<2x128xf32>
    %19 = tpu.matmul %17, %18, %cst_14 {dimension_numbers = #tpu.dot_dimension_numbers<[1], [0], [0], [1], [0, 0, 1, 1], [], []>} : vector<2x128xbf16>, vector<128x128xbf16>, vector<2x128xf32> -> vector<2x128xf32>
    %c0_15 = arith.constant 0 : index
    %c0_16 = arith.constant 0 : index
    %20 = vector.load %arg8[%c0_15, %c0_16] : memref<1x128xf32, #tpu.memory_space<vmem>>, vector<1x128xf32>
    %21 = vector.broadcast %20 : vector<1x128xf32> to vector<2x128xf32>
    %22 = arith.addf %19, %21 : vector<2x128xf32>
    %cst_17 = arith.constant 0.000000e+00 : f32
    %23 = vector.broadcast %cst_17 : f32 to vector<2x128xf32>
    %24 = arith.maximumf %22, %23 : vector<2x128xf32>
    %25 = arith.truncf %24 : vector<2x128xf32> to vector<2x128xbf16>
    %c0_18 = arith.constant 0 : index
    %c0_19 = arith.constant 0 : index
    %26 = vector.load %arg9[%c0_18, %c0_19] : memref<128x128xbf16, #tpu.memory_space<vmem>>, vector<128x128xbf16>
    %cst_20 = arith.constant dense<0.000000e+00> : vector<2x128xf32>
    %27 = tpu.matmul %25, %26, %cst_20 {dimension_numbers = #tpu.dot_dimension_numbers<[1], [0], [0], [1], [0, 0, 1, 1], [], []>} : vector<2x128xbf16>, vector<128x128xbf16>, vector<2x128xf32> -> vector<2x128xf32>
    %c0_21 = arith.constant 0 : index
    %c0_22 = arith.constant 0 : index
    %28 = vector.load %arg10[%c0_21, %c0_22] : memref<1x128xf32, #tpu.memory_space<vmem>>, vector<1x128xf32>
    %29 = vector.broadcast %28 : vector<1x128xf32> to vector<2x128xf32>
    %30 = arith.addf %27, %29 : vector<2x128xf32>
    %cst_23 = arith.constant 0.000000e+00 : f32
    %31 = vector.broadcast %cst_23 : f32 to vector<2x128xf32>
    %32 = arith.maximumf %30, %31 : vector<2x128xf32>
    %33 = arith.truncf %32 : vector<2x128xf32> to vector<2x128xbf16>
    %c0_24 = arith.constant 0 : index
    %c0_25 = arith.constant 0 : index
    %34 = vector.load %arg11[%c0_24, %c0_25] : memref<128x128xbf16, #tpu.memory_space<vmem>>, vector<128x128xbf16>
    %cst_26 = arith.constant dense<0.000000e+00> : vector<2x128xf32>
    %35 = tpu.matmul %33, %34, %cst_26 {dimension_numbers = #tpu.dot_dimension_numbers<[1], [0], [0], [1], [0, 0, 1, 1], [], []>} : vector<2x128xbf16>, vector<128x128xbf16>, vector<2x128xf32> -> vector<2x128xf32>
    %c0_27 = arith.constant 0 : index
    %c0_28 = arith.constant 0 : index
    %36 = vector.load %arg12[%c0_27, %c0_28] : memref<1x128xf32, #tpu.memory_space<vmem>>, vector<1x128xf32>
    %37 = vector.broadcast %36 : vector<1x128xf32> to vector<2x128xf32>
    %38 = arith.addf %35, %37 : vector<2x128xf32>
    %39 = math.tanh %38 : vector<2x128xf32>
    %40 = tpu.iota {dimensions = array<i32: 1>} : vector<1x128xi32>
    %c0_i32 = arith.constant 0 : i32
    %41 = vector.broadcast %c0_i32 : i32 to vector<1x128xi32>
    %42 = arith.cmpi eq, %40, %41 : vector<1x128xi32>
    %c0_29 = arith.constant 0 : index
    %43 = memref.load %arg1[%c0_29] : memref<4xf32, #tpu.memory_space<smem>>
    %c1_i32 = arith.constant 1 : i32
    %44 = vector.broadcast %c1_i32 : i32 to vector<1x128xi32>
    %45 = arith.cmpi eq, %40, %44 : vector<1x128xi32>
    %c1 = arith.constant 1 : index
    %46 = memref.load %arg1[%c1] : memref<4xf32, #tpu.memory_space<smem>>
    %cst_30 = arith.constant 1.000000e+00 : f32
    %47 = vector.broadcast %46 : f32 to vector<1x128xf32>
    %48 = vector.broadcast %cst_30 : f32 to vector<1x128xf32>
    %49 = arith.select %45, %47, %48 : vector<1x128xi1>, vector<1x128xf32>
    %50 = vector.broadcast %43 : f32 to vector<1x128xf32>
    %51 = arith.select %42, %50, %49 : vector<1x128xi1>, vector<1x128xf32>
    %c0_i32_31 = arith.constant 0 : i32
    %52 = vector.broadcast %c0_i32_31 : i32 to vector<1x128xi32>
    %53 = arith.cmpi eq, %40, %52 : vector<1x128xi32>
    %c2 = arith.constant 2 : index
    %54 = memref.load %arg1[%c2] : memref<4xf32, #tpu.memory_space<smem>>
    %c1_i32_32 = arith.constant 1 : i32
    %55 = vector.broadcast %c1_i32_32 : i32 to vector<1x128xi32>
    %56 = arith.cmpi eq, %40, %55 : vector<1x128xi32>
    %c3 = arith.constant 3 : index
    %57 = memref.load %arg1[%c3] : memref<4xf32, #tpu.memory_space<smem>>
    %cst_33 = arith.constant 0.000000e+00 : f32
    %58 = vector.broadcast %57 : f32 to vector<1x128xf32>
    %59 = vector.broadcast %cst_33 : f32 to vector<1x128xf32>
    %60 = arith.select %56, %58, %59 : vector<1x128xi1>, vector<1x128xf32>
    %61 = vector.broadcast %54 : f32 to vector<1x128xf32>
    %62 = arith.select %53, %61, %60 : vector<1x128xi1>, vector<1x128xf32>
    %63 = vector.broadcast %51 : vector<1x128xf32> to vector<2x128xf32>
    %64 = arith.mulf %39, %63 : vector<2x128xf32>
    %65 = vector.broadcast %62 : vector<1x128xf32> to vector<2x128xf32>
    %66 = arith.addf %64, %65 : vector<2x128xf32>
    %c0_34 = arith.constant 0 : index
    %c0_35 = arith.constant 0 : index
    %67 = vector.load %arg13[%c0_34, %c0_35] : memref<2x128xf32, #tpu.memory_space<vmem>>, vector<2x128xf32>
    tpu.vector_store %arg13[%c0_34, %c0_35], %66 {strides = array<i32>} : memref<2x128xf32, #tpu.memory_space<vmem>>, vector<2x128xf32>,
    return
  }
  func.func @transform_0(%arg0: i32) -> i32 {
    %c0_i32 = arith.constant 0 : i32
    %c0_i32_0 = arith.constant 0 : i32
    return %c0_i32 : i32
  }
  func.func @transform_1(%arg0: i32) -> (i32, i32) {
    %c0_i32 = arith.constant 0 : i32
    %c0_i32_0 = arith.constant 0 : i32
    return %arg0, %c0_i32 : i32, i32
  }
  func.func @transform_2(%arg0: i32) -> (i32, i32) {
    %c0_i32 = arith.constant 0 : i32
    %c0_i32_0 = arith.constant 0 : i32
    %c0_i32_1 = arith.constant 0 : i32
    return %c0_i32, %c0_i32_0 : i32, i32
  }
  func.func @transform_3(%arg0: i32) -> (i32, i32) {
    %c0_i32 = arith.constant 0 : i32
    %c0_i32_0 = arith.constant 0 : i32
    %c0_i32_1 = arith.constant 0 : i32
    return %c0_i32, %c0_i32_0 : i32, i32
  }
  func.func @transform_4(%arg0: i32) -> (i32, i32) {
    %c0_i32 = arith.constant 0 : i32
    %c0_i32_0 = arith.constant 0 : i32
    %c0_i32_1 = arith.constant 0 : i32
    return %c0_i32, %c0_i32_0 : i32, i32
  }
  func.func @transform_5(%arg0: i32) -> (i32, i32) {
    %c0_i32 = arith.constant 0 : i32
    %c0_i32_0 = arith.constant 0 : i32
    %c0_i32_1 = arith.constant 0 : i32
    return %c0_i32, %c0_i32_0 : i32, i32
  }
  func.func @transform_6(%arg0: i32) -> (i32, i32) {
    %c0_i32 = arith.constant 0 : i32
    %c0_i32_0 = arith.constant 0 : i32
    %c0_i32_1 = arith.constant 0 : i32
    return %c0_i32, %c0_i32_0 : i32, i32
  }
  func.func @transform_7(%arg0: i32) -> (i32, i32) {
    %c0_i32 = arith.constant 0 : i32
    %c0_i32_0 = arith.constant 0 : i32
    %c0_i32_1 = arith.constant 0 : i32
    return %c0_i32, %c0_i32_0 : i32, i32
  }
  func.func @transform_8(%arg0: i32) -> (i32, i32) {
    %c0_i32 = arith.constant 0 : i32
    %c0_i32_0 = arith.constant 0 : i32
    %c0_i32_1 = arith.constant 0 : i32
    return %c0_i32, %c0_i32_0 : i32, i32
  }
  func.func @transform_9(%arg0: i32) -> (i32, i32) {
    %c0_i32 = arith.constant 0 : i32
    %c0_i32_0 = arith.constant 0 : i32
    %c0_i32_1 = arith.constant 0 : i32
    return %c0_i32, %c0_i32_0 : i32, i32
  }
  func.func @transform_10(%arg0: i32) -> (i32, i32) {
    %c0_i32 = arith.constant 0 : i32
    %c0_i32_0 = arith.constant 0 : i32
    %c0_i32_1 = arith.constant 0 : i32
    return %c0_i32, %c0_i32_0 : i32, i32
  }
  func.func @transform_11(%arg0: i32) -> (i32, i32) {
    %c0_i32 = arith.constant 0 : i32
    %c0_i32_0 = arith.constant 0 : i32
    %c0_i32_1 = arith.constant 0 : i32
    return %c0_i32, %c0_i32_0 : i32, i32
  }
  func.func @transform_12(%arg0: i32) -> (i32, i32) {
    %c0_i32 = arith.constant 0 : i32
    %c0_i32_0 = arith.constant 0 : i32
    return %arg0, %c0_i32 : i32, i32
  }
}

</mosaic_0001>

<bundles_post_ra>
// kernel: proposer_forward.1
= control target key start
LH: loop header
LB: loop body
LE: loop exit
PB: predicated region body
PF: predicated region fallthrough
CT: control target
= control target key end

     0   :  { %17 = vsyncpa [#allocation4], 0  ;;  %s1370_s0 = inlined_call_operand.vmem [shape: f32[4], index: 0, kind: input, shape index: {}]   ;;  %s1371_s1 = inlined_call_operand.vmem [shape: f32[2,256], index: 1, kind: input, shape index: {}]   ;;  %s1372_s2 = inlined_call_operand.hbm [shape: bf16[256,128], index: 2, kind: input, shape index: {}]   ;;  %s1373_s3 = inlined_call_operand.vmem [shape: f32[1,128], index: 3, kind: input, shape index: {}]   ;;  %s1374_s4 = inlined_call_operand.vmem [shape: bf16[128,128], index: 4, kind: input, shape index: {}]   ;;  %s1375_s5 = inlined_call_operand.vmem [shape: f32[1,128], index: 5, kind: input, shape index: {}]   ;;  %s1376_s6 = inlined_call_operand.hbm [shape: bf16[128,128], index: 6, kind: input, shape index: {}]   ;;  %s1377_s7 = inlined_call_operand.vmem [shape: f32[1,128], index: 7, kind: input, shape index: {}]   ;;  %s1378_s8 = inlined_call_operand.hbm [shape: bf16[128,128], index: 8, kind: input, shape index: {}]   ;;  %s1379_s9 = inlined_call_operand.vmem [shape: f32[1,128], index: 9, kind: input, shape index: {}]   ;;  %s1380_s10 = inlined_call_operand.hbm [shape: bf16[128,128], index: 10, kind: input, shape index: {}]   ;;  %s1381_s11 = inlined_call_operand.vmem [shape: f32[1,128], index: 11, kind: input, shape index: {}]   ;;  %s1382_s12 = inlined_call_operand.vmem [shape: f32[2,128], index: 12, kind: output, shape index: {}]  }
   0x1   :  { %18 = vsyncpa [#allocation3], 0 }
   0x2   :  { %19 = vsyncpa [#allocation7], 0 }
   0x3   :  { %20 = vsyncpa [#allocation10], 0  ;;  %s27_s23 = sshll.u32 %s1370_s0, 4  ;;  %s1141_s24 = smov [#allocation6]   ;;  %s28_s23 = int_to_ptr.vmem [resolvable:$true] %s27_s23 }
   0x4   :  { %s56_s25 = sshll.u32 %s1141_s24, 4  ;;  %s1033_s28 = scalar_lea.hbm %s1376_s6, 1024  ;;  %s57_s25 = int_to_ptr.vmem [resolvable:$true] %s56_s25 }
   0x5   :  { %p1034_p0 = scmp.ne.s32.totalorder %s1376_s6, %s1033_s28  ;;  %p1037_p1 = scmp.lt.u32.totalorder %s1033_s28, %s1376_s6 }
   0x7   :  { %p1039_p2 = pnand %p1037_p1, %p1034_p0 }
   0x9   :  { %1042 = shalt.err (!%p1039_p2)
}
   0xa   :  { %s1043_s15 = scalar_lea.vmem %s57_s25, 1024  ;;  %p1048_p4 = scmp.lt.s32.totalorder %s57_s25, %s57_s25 }
   0xb   :  { %p1044_p3 = scmp.ne.s32.totalorder %s57_s25, %s1043_s15  ;;  %p1049_p5 = scmp.lt.s32.totalorder %s1043_s15, %s1043_s15 }
   0xd   :  { %p1050_p6 = por %p1049_p5, %p1048_p4 }
   0xf   :  { %p1051_p7 = pnand %p1050_p6, %p1044_p3 }
  0x11   :  { %1054 = shalt.err (!%p1051_p7)
}
  0x12   :  { %s1142_s0 = smov 64   ;;  %s1143_s16 = smov 4  }
  0x13   :  { %62 = dma.hbm_to_vmem [thread:$0]  %s1376_s6, 1024, %s57_s25, [#allocation7], %s1142_s0, %s1142_s0, %s1143_s16  }
  0x14   :  { %s1055_s19 = scalar_lea.vmem %s28_s23, 16  ;;  %p1060_p9 = scmp.lt.s32.totalorder %s28_s23, %s28_s23 }
  0x15   :  { %p1056_p8 = scmp.ne.s32.totalorder %s28_s23, %s1055_s19  ;;  %p1061_p10 = scmp.lt.s32.totalorder %s1055_s19, %s1055_s19 }
  0x17   :  { %p1062_p11 = por %p1061_p10, %p1060_p9 }
  0x19   :  { %p1063_p12 = pnand %p1062_p11, %p1056_p8 }
  0x1b   :  { %1066 = shalt.err (!%p1063_p12)
}
  0x1c   :  { %s1144_s20 = smov [#allocation2]   ;;  %s1145_s21 = smov [#allocation5]  }
  0x1d   :  { %30 = dma.vmem_to_smem %s28_s23, 16, %s1144_s20, [#allocation4]  }
  0x1e   :  { %s38_s22 = sshll.u32 %s1145_s21, 4  ;;  %s1146_s24 = smov [#allocation8]   ;;  %s39_s22 = int_to_ptr.vmem [resolvable:$true] %s38_s22 }
  0x1f   :  { %s70_s26 = sshll.u32 %s1146_s24, 4  ;;  %s1067_s6 = scalar_lea.hbm %s1372_s2, 2048  ;;  %s1233_s26 = int_to_ptr.vmem [resolvable:$true] %s70_s26 }
  0x20   :  { %p1068_p13 = scmp.ne.s32.totalorder %s1372_s2, %s1067_s6  ;;  %p1071_p0 = scmp.lt.u32.totalorder %s1067_s6, %s1372_s2 }
  0x22   :  { %p1073_p1 = pnand %p1071_p0, %p1068_p13 }
  0x24   :  { %1076 = shalt.err (!%p1073_p1)
}
  0x25   :  { %s1077_s23 = scalar_lea.vmem %s39_s22, 2048  ;;  %p1082_p3 = scmp.lt.s32.totalorder %s39_s22, %s39_s22 }
  0x26   :  { %p1078_p2 = scmp.ne.s32.totalorder %s39_s22, %s1077_s23  ;;  %p1083_p4 = scmp.lt.s32.totalorder %s1077_s23, %s1077_s23 }
  0x28   :  { %p1084_p5 = por %p1083_p4, %p1082_p3 }
  0x2a   :  { %p1085_p6 = pnand %p1084_p5, %p1078_p2 }
  0x2c   :  { %1088 = shalt.err (!%p1085_p6)
}
  0x2d   :  { %44 = dma.hbm_to_vmem [thread:$0]  %s1372_s2, 2048, %s39_s22, [#allocation3], %s1142_s0, %s1142_s0, %s1143_s16  }
  0x2e   :  { %s1089_s19 = scalar_lea.hbm %s1378_s8, 1024 }
  0x2f   :  { %p1090_p7 = scmp.ne.s32.totalorder %s1378_s8, %s1089_s19  ;;  %p1093_p8 = scmp.lt.u32.totalorder %s1089_s19, %s1378_s8 }
  0x31   :  { %p1095_p9 = pnand %p1093_p8, %p1090_p7 }
  0x33   :  { %1098 = shalt.err (!%p1095_p9)
}
  0x34   :  { %s1099_s28 = scalar_lea.vmem %s1233_s26, 1024  ;;  %p1104_p11 = scmp.lt.s32.totalorder %s1233_s26, %s1233_s26 }
  0x35   :  { %p1100_p10 = scmp.ne.s32.totalorder %s1233_s26, %s1099_s28  ;;  %p1105_p12 = scmp.lt.s32.totalorder %s1099_s28, %s1099_s28 }
  0x37   :  { %p1106_p13 = por %p1105_p12, %p1104_p11 }
  0x39   :  { %p1107_p0 = pnand %p1106_p13, %p1100_p10 }
  0x3b   :  { %1110 = shalt.err (!%p1107_p0)
}
  0x3c   :  { %76 = dma.hbm_to_vmem [thread:$0]  %s1378_s8, 1024, %s1233_s26, [#allocation7], %s1142_s0, %s1142_s0, %s1143_s16  }
  0x3d   :  { %s1147_s6 = smov [#allocation9]   ;;  %s1111_s13 = scalar_lea.hbm %s1380_s10, 1024 }
  0x3e   :  { %s84_s25 = sshll.u32 %s1147_s6, 4  ;;  %p1112_p1 = scmp.ne.s32.totalorder %s1380_s10, %s1111_s13  ;;  %s85_s25 = int_to_ptr.vmem [resolvable:$true] %s84_s25 }
  0x3f   :  { %p1115_p2 = scmp.lt.u32.totalorder %s1111_s13, %s1380_s10 }
  0x41   :  { %p1117_p3 = pnand %p1115_p2, %p1112_p1 }
  0x43   :  { %1120 = shalt.err (!%p1117_p3)
}
  0x44   :  { %s1121_s18 = scalar_lea.vmem %s85_s25, 1024  ;;  %p1126_p5 = scmp.lt.s32.totalorder %s85_s25, %s85_s25 }
  0x45   :  { %p1122_p4 = scmp.ne.s32.totalorder %s85_s25, %s1121_s18  ;;  %p1127_p6 = scmp.lt.s32.totalorder %s1121_s18, %s1121_s18 }
  0x47   :  { %p1128_p7 = por %p1127_p6, %p1126_p5 }
  0x49   :  { %p1129_p8 = pnand %p1128_p7, %p1122_p4 }
  0x4b   :  { %1132 = shalt.err (!%p1129_p8)
}
  0x4c   :  { %90 = dma.hbm_to_vmem [thread:$0]  %s1380_s10, 1024, %s85_s25, [#allocation10], %s1142_s0, %s1142_s0, %s1143_s16  }
  0x4d   :  { %1133 = dma.done.wait [#allocation4], 16  }
  0x4e   :  { %1134 = vsyncadd [#allocation4], 4294967280 }
  0x4f   :  { %1135 = dma.done.wait [#allocation3], 2048  }
  0x50   :  { %1136 = vsyncadd [#allocation3], 4294965248 }
  0x51   :  { %1137 = dma.done.wait [#allocation7], 2048  }
  0x52   :  { %1138 = vsyncadd [#allocation7], 4294965248 }
  0x53   :  { %1139 = dma.done.wait [#allocation10], 1024  }
  0x54   :  { %1140 = vsyncadd [#allocation10], 4294966272 }
  0x55   :  { %108 = sfence }
  0x56   :  { %v983_v0 = vld [vmem:[#allocation5 + $0x40] sm:$0xff]   ;;  %v1148_v2 = vmov 0.0   ;;  %v985_v3 = vld [vmem:[#allocation5 + $0x48] sm:$0xff]   ;;  %v987_v5 = vld [vmem:[#allocation5 + $0x50] sm:$0xff]   ;;  %vm1149_vm0 = vmmov 0   ;;  %s835_s0 = sld [smem:[#allocation2 + $0x3]] }
  0x57   :  { %v984_v1 = vld [vmem:[#allocation5] sm:$0xff]   ;;  %894 = vmatprep.subr.bf16.mxu1 %v1148_v2  ;;  %836 = vmatprep.subr.bf16.mxu0 %v983_v0  ;;  %v986_v4 = vld [vmem:[#allocation5 + $0x8] sm:$0xff]   ;;  %v988_v6 = vld [vmem:[#allocation5 + $0x10] sm:$0xff]   ;;  %s755_s16 = sld [smem:[#allocation2]] }
  0x58   :  { %837 = vmatpush3.bf16.msra.mxu0 %v984_v1  ;;  %v989_v7 = vld [vmem:[#allocation5 + $0x58] sm:$0xff]   ;;  %v991_v9 = vld [vmem:[#allocation5 + $0x60] sm:$0xff]   ;;  %v993_v11 = vld [vmem:[#allocation5 + $0x68] sm:$0xff]   ;;  %910 = vmatprep.mubr.msk.bf16.mxu1 %vm1149_vm0, %v1148_v2 }
  0x59   :  { %838 = vmatprep.subr.bf16.mxu0 %v985_v3  ;;  %v990_v8 = vld [vmem:[#allocation5 + $0x18] sm:$0xff]   ;;  %v992_v10 = vld [vmem:[#allocation5 + $0x20] sm:$0xff]   ;;  %v994_v15 = vld [vmem:[#allocation5 + $0x28] sm:$0xff]  }
  0x5a   :  { %v779_v12 = vld.sshfl [vmem:[%s1371_s1] sm:$0x33 pattern:$0x76325410]  ;;  %v1000_v17 = vld [vmem:[%s1374_s4 + $0x8] sm:$0xff]   ;;  %v995_v18 = vld [vmem:[#allocation5 + $0x70] sm:$0xff]  }
  0x5b   :  { %v119_v13 = vcombine.high %v779_v12, %v779_v12  ;;  %v999_v14 = vld [vmem:[%s1374_s4] sm:$0xff]   ;;  %v996_v19 = vld [vmem:[#allocation5 + $0x30] sm:$0xff]   ;;  %v997_v20 = vld [vmem:[#allocation5 + $0x78] sm:$0xff]   ;;  %v122_v25 = vpack.c.bf16 %v779_v12, %v779_v12 }
  0x5c   :  { %839 = vmatpush3.bf16.msra.mxu0 %v986_v4  ;;  %895 = vmatpush3.bf16.msra.mxu1 %v999_v14  ;;  %v1001_v21 = vld [vmem:[%s1374_s4 + $0x10] sm:$0xff]   ;;  %v998_v22 = vld [vmem:[#allocation5 + $0x38] sm:$0xff]   ;;  %v1003_v24 = vld [vmem:[%s1374_s4 + $0x20] sm:$0xff]  }
  0x5d   :  { %840 = vmatprep.subr.bf16.mxu0 %v987_v5  ;;  %v123_v16 = vpack.c.bf16 %v119_v13, %v119_v13  ;;  %896 = vmatprep.subr.bf16.mxu1 %v1148_v2  ;;  %v1002_v23 = vld [vmem:[%s1374_s4 + $0x18] sm:$0xff]   ;;  %v1004_v26 = vld [vmem:[%s1374_s4 + $0x28] sm:$0xff]   ;;  %v1005_v27 = vld [vmem:[%s1374_s4 + $0x30] sm:$0xff]  }
  0x5e   :  { %v1006_v28 = vld [vmem:[%s1374_s4 + $0x38] sm:$0xff]   ;;  %v1007_v29 = vld [vmem:[#allocation6] sm:$0xff]   ;;  %v1008_v30 = vld [vmem:[#allocation6 + $0x8] sm:$0xff]  }
  0x5f   :  { %291 = vmatprep.mubr.bf16.mxu0 %v123_v16  ;;  %v1009_v31 = vld [vmem:[#allocation6 + $0x10] sm:$0xff]   ;;  %v1010_v32 = vld [vmem:[#allocation6 + $0x18] sm:$0xff]   ;;  %v1011_v33 = vld [vmem:[#allocation6 + $0x20] sm:$0xff]  }
  0x60   :  { %841 = vmatpush3.bf16.msra.mxu0 %v988_v6  ;;  %897 = vmatpush3.bf16.msra.mxu1 %v1000_v17  ;;  %v1012_v34 = vld [vmem:[#allocation6 + $0x28] sm:$0xff]   ;;  %v780_v36 = vld [vmem:[%s1373_s3] ss:$0 sm:$0xff]  ;;  %v1013_v44 = vld [vmem:[#allocation6 + $0x30] sm:$0xff]  }
  0x61   :  { %842 = vmatprep.subr.bf16.mxu0 %v989_v7  ;;  %898 = vmatprep.subr.bf16.mxu1 %v1148_v2  ;;  %v1014_v45 = vld [vmem:[#allocation6 + $0x38] sm:$0xff]   ;;  %v1015_v46 = vld [vmem:[#allocation8] sm:$0xff]   ;;  %v1016_v47 = vld [vmem:[#allocation8 + $0x8] sm:$0xff]  }
  0x62   :  { %v1017_v48 = vld [vmem:[#allocation8 + $0x10] sm:$0xff]   ;;  %v1018_v49 = vld [vmem:[#allocation8 + $0x18] sm:$0xff]   ;;  %v1019_v50 = vld [vmem:[#allocation8 + $0x20] sm:$0xff]  }
  0x63   :  { %v1020_v51 = vld [vmem:[#allocation8 + $0x28] sm:$0xff]   ;;  %v797_v52 = vld [vmem:[%s1375_s5] ss:$0 sm:$0xff]  ;;  %v1021_v60 = vld [vmem:[#allocation8 + $0x30] sm:$0xff]  }
  0x64   :  { %843 = vmatpush3.bf16.msra.mxu0 %v990_v8  ;;  %899 = vmatpush3.bf16.msra.mxu1 %v1001_v21  ;;  %v1022_v61 = vld [vmem:[#allocation8 + $0x38] sm:$0xff]   ;;  %v1023_v62 = vld [vmem:[#allocation9] sm:$0xff]   ;;  %v1024_v63 = vld [vmem:[#allocation9 + $0x8] sm:$0xff]  }
  0x65   :  { %844 = vmatprep.subr.bf16.mxu0 %v991_v9  ;;  %900 = vmatprep.subr.bf16.mxu1 %v1148_v2  ;;  %v1025_v0 = vld [vmem:[#allocation9 + $0x10] sm:$0xff]   ;;  %v1026_v1 = vld [vmem:[#allocation9 + $0x18] sm:$0xff]   ;;  %v1027_v3 = vld [vmem:[#allocation9 + $0x20] sm:$0xff]  }
  0x66   :  { %v1028_v4 = vld [vmem:[#allocation9 + $0x28] sm:$0xff]   ;;  %v806_v5 = vld [vmem:[%s1377_s7] ss:$0 sm:$0xff]  ;;  %v1029_v13 = vld [vmem:[#allocation9 + $0x30] sm:$0xff]   ;;  %s833_s7 = sld [smem:[#allocation2 + $0x1]] }
  0x67   :  { %v1030_v14 = vld [vmem:[#allocation9 + $0x38] sm:$0xff]  }
  0x68   :  { %845 = vmatpush3.bf16.msra.mxu0 %v992_v10  ;;  %901 = vmatpush3.bf16.msra.mxu1 %v1002_v23  ;;  %v752_v23 = vlaneseq }
  0x69   :  { %846 = vmatprep.subr.bf16.mxu0 %v993_v11  ;;  %902 = vmatprep.subr.bf16.mxu1 %v1148_v2 }
  0x6c   :  { %847 = vmatpush3.bf16.msra.mxu0 %v994_v15  ;;  %903 = vmatpush3.bf16.msra.mxu1 %v1003_v24  ;;  %v815_v15 = vld [vmem:[%s1379_s9] ss:$0 sm:$0xff]  ;;  %s834_s9 = sld [smem:[#allocation2 + $0x2]] }
  0x6d   :  { %848 = vmatprep.subr.bf16.mxu0 %v995_v18  ;;  %904 = vmatprep.subr.bf16.mxu1 %v1148_v2 }
  0x70   :  { %849 = vmatpush3.bf16.msra.mxu0 %v996_v19  ;;  %905 = vmatpush3.bf16.msra.mxu1 %v1004_v26  ;;  %v753_v26 = vand.u32 127, %v752_v23 }
  0x71   :  { %850 = vmatprep.subr.bf16.mxu0 %v997_v20  ;;  %906 = vmatprep.subr.bf16.mxu1 %v1148_v2 }
  0x72   :  { %vm756_vm1 = vcmp.eq.s32.totalorder %v753_v26, 1  ;;  %vm754_vm2 = vcmp.eq.s32.totalorder %v753_v26, 0 }
  0x74   :  { %851 = vmatpush3.bf16.msra.mxu0 %v998_v22  ;;  %907 = vmatpush3.bf16.msra.mxu1 %v1005_v27 }
  0x75   :  { %914 = vmatprep.subr.bf16.mxu0 %v1148_v2  ;;  %908 = vmatprep.subr.bf16.mxu1 %v1148_v2 }
  0x77   :  { %292 = vmatmul.mubr.bf16.vlgmr.msra.gmra.mrb[0].mxu0 %v122_v25 }
  0x78   :  { %909 = vmatpush3.bf16.msra.mxu1 %v1006_v28  ;;  %930 = vmatprep.mubr.msk.bf16.mxu0 %vm1149_vm0, %v1148_v2 }
  0x79   :  { %934 = vmatprep.subr.bf16.mxu1 %v1148_v2  ;;  %915 = vmatpush3.bf16.msra.mxu0 %v1007_v29 }
  0x7a   :  { %916 = vmatprep.subr.bf16.mxu0 %v1148_v2 }
  0x7d   :  { %917 = vmatpush3.bf16.msra.mxu0 %v1008_v30  ;;  %v758_v30 = vstv %s833_s7 }
  0x7e   :  { %918 = vmatprep.subr.bf16.mxu0 %v1148_v2 }
  0x81   :  { %919 = vmatpush3.bf16.msra.mxu0 %v1009_v31  ;;  %v764_v31 = vstv %s835_s0 }
  0x82   :  { %920 = vmatprep.subr.bf16.mxu0 %v1148_v2 }
  0x85   :  { %921 = vmatpush3.bf16.msra.mxu0 %v1010_v32  ;;  %v759_v32 = vsel %vm756_vm1, %v758_v30, 1.0 }
  0x86   :  { %922 = vmatprep.subr.bf16.mxu0 %v1148_v2 }
  0x89   :  { %923 = vmatpush3.bf16.msra.mxu0 %v1011_v33  ;;  %v760_v33 = vstv %s755_s16 }
  0x8a   :  { %924 = vmatprep.subr.bf16.mxu0 %v1148_v2 }
  0x8d   :  { %925 = vmatpush3.bf16.msra.mxu0 %v1012_v34  ;;  %v765_v34 = vsel %vm756_vm1, %v764_v31, 0.0 }
  0x8e   :  { %926 = vmatprep.subr.bf16.mxu0 %v1148_v2 }
  0x91   :  { %927 = vmatpush3.bf16.msra.mxu0 %v1013_v44 }
  0x92   :  { %928 = vmatprep.subr.bf16.mxu0 %v1148_v2 }
  0x95   :  { %929 = vmatpush3.bf16.msra.mxu0 %v1014_v45 }
  0x96   :  { %954 = vmatprep.subr.bf16.mxu0 %v1148_v2 }
 0x14a   :  { %v852_v35 = vpop.f32.mrb[0].mxu0 }
 0x14b   :  { %v853_v37 = vpop.f32.mrb[1].mxu0 }
 0x14c   :  { %v854_v38 = vadd.f32 %v853_v37, %v852_v35  ;;  %v855_v39 = vpop.f32.mrb[2].mxu0  ;;  %v766_v35 = vstv %s834_s9 }
 0x14d   :  { %v856_v40 = vpop.f32.mrb[3].mxu0 }
 0x14e   :  { %v294_v41 = vadd.f32 %v854_v38, %v780_v36  ;;  %v761_v36 = vsel %vm754_vm2, %v760_v33, %v759_v32  ;;  %v767_v38 = vsel %vm754_vm2, %v766_v35, %v765_v34 }
 0x150   :  { %v299_v42 = vmax.f32 %v294_v41, 0.0 }
 0x152   :  { %v300_v43 = vpack.c.bf16 %v299_v42, %v299_v42 }
 0x154   :  { %911 = vmatmul.mubr.bf16.vlgmr.msra.gmra.mrb[0].mxu1 %v300_v43 }
 0x155   :  { %950 = vmatprep.mubr.msk.bf16.mxu1 %vm1149_vm0, %v1148_v2  ;;  %935 = vmatpush3.bf16.msra.mxu1 %v1015_v46 }
 0x156   :  { %936 = vmatprep.subr.bf16.mxu1 %v1148_v2 }
 0x159   :  { %937 = vmatpush3.bf16.msra.mxu1 %v1016_v47 }
 0x15a   :  { %938 = vmatprep.subr.bf16.mxu1 %v1148_v2 }
 0x15d   :  { %939 = vmatpush3.bf16.msra.mxu1 %v1017_v48 }
 0x15e   :  { %940 = vmatprep.subr.bf16.mxu1 %v1148_v2 }
 0x161   :  { %941 = vmatpush3.bf16.msra.mxu1 %v1018_v49 }
 0x162   :  { %942 = vmatprep.subr.bf16.mxu1 %v1148_v2 }
 0x165   :  { %943 = vmatpush3.bf16.msra.mxu1 %v1019_v50 }
 0x166   :  { %944 = vmatprep.subr.bf16.mxu1 %v1148_v2 }
 0x169   :  { %945 = vmatpush3.bf16.msra.mxu1 %v1020_v51 }
 0x16a   :  { %946 = vmatprep.subr.bf16.mxu1 %v1148_v2 }
 0x16d   :  { %947 = vmatpush3.bf16.msra.mxu1 %v1021_v60 }
 0x16e   :  { %948 = vmatprep.subr.bf16.mxu1 %v1148_v2 }
 0x171   :  { %949 = vmatpush3.bf16.msra.mxu1 %v1022_v61 }
 0x227   :  { %v406_v53 = vpop.f32.mrb[0].mxu1 }
 0x228   :  { %v407_v54 = vadd.f32 %v797_v52, %v406_v53  ;;  %v912_v55 = vpop.f32.mrb[1].mxu1 }
 0x229   :  { %v409_v56 = vpop.f32.mrb[2].mxu1 }
 0x22a   :  { %v412_v57 = vmax.f32 %v407_v54, 0.0  ;;  %v913_v58 = vpop.f32.mrb[3].mxu1 }
 0x22c   :  { %v413_v59 = vpack.c.bf16 %v412_v57, %v412_v57 }
 0x22e   :  { %931 = vmatmul.mubr.bf16.vlgmr.msra.gmra.mrb[4].mxu0 %v413_v59 }
 0x22f   :  { %970 = vmatprep.mubr.msk.bf16.mxu0 %vm1149_vm0, %v1148_v2  ;;  %955 = vmatpush3.bf16.msra.mxu0 %v1023_v62 }
 0x230   :  { %956 = vmatprep.subr.bf16.mxu0 %v1148_v2 }
 0x233   :  { %957 = vmatpush3.bf16.msra.mxu0 %v1024_v63 }
 0x234   :  { %958 = vmatprep.subr.bf16.mxu0 %v1148_v2 }
 0x237   :  { %959 = vmatpush3.bf16.msra.mxu0 %v1025_v0 }
 0x238   :  { %960 = vmatprep.subr.bf16.mxu0 %v1148_v2 }
 0x23b   :  { %961 = vmatpush3.bf16.msra.mxu0 %v1026_v1 }
 0x23c   :  { %962 = vmatprep.subr.bf16.mxu0 %v1148_v2 }
 0x23f   :  { %963 = vmatpush3.bf16.msra.mxu0 %v1027_v3 }
 0x240   :  { %964 = vmatprep.subr.bf16.mxu0 %v1148_v2 }
 0x243   :  { %965 = vmatpush3.bf16.msra.mxu0 %v1028_v4 }
 0x244   :  { %966 = vmatprep.subr.bf16.mxu0 %v1148_v2 }
 0x247   :  { %967 = vmatpush3.bf16.msra.mxu0 %v1029_v13 }
 0x248   :  { %968 = vmatprep.subr.bf16.mxu0 %v1148_v2  ;;  %v824_v2 = vld [vmem:[%s1381_s11] ss:$0 sm:$0xff] }
 0x24b   :  { %969 = vmatpush3.bf16.msra.mxu0 %v1030_v14 }
 0x301   :  { %v519_v6 = vpop.f32.mrb[4].mxu0 }
 0x302   :  { %v520_v7 = vadd.f32 %v806_v5, %v519_v6  ;;  %v932_v8 = vpop.f32.mrb[5].mxu0 }
 0x303   :  { %v522_v9 = vpop.f32.mrb[6].mxu0 }
 0x304   :  { %v525_v10 = vmax.f32 %v520_v7, 0.0  ;;  %v933_v11 = vpop.f32.mrb[7].mxu0 }
 0x306   :  { %v526_v12 = vpack.c.bf16 %v525_v10, %v525_v10 }
 0x308   :  { %951 = vmatmul.mubr.bf16.vlgmr.msra.gmra.mrb[4].mxu1 %v526_v12 }
 0x3db   :  { %v632_v16 = vpop.f32.mrb[4].mxu1 }
 0x3dc   :  { %v633_v17 = vadd.f32 %v815_v15, %v632_v16  ;;  %v952_v18 = vpop.f32.mrb[5].mxu1 }
 0x3dd   :  { %v635_v19 = vpop.f32.mrb[6].mxu1 }
 0x3de   :  { %v638_v20 = vmax.f32 %v633_v17, 0.0  ;;  %v953_v21 = vpop.f32.mrb[7].mxu1 }
 0x3e0   :  { %v639_v22 = vpack.c.bf16 %v638_v20, %v638_v20 }
 0x3e2   :  { %971 = vmatmul.mubr.bf16.vlgmr.msra.gmra.mrb[8].mxu0 %v639_v22 }
 0x4b5   :  { %v745_v24 = vpop.f32.mrb[8].mxu0 }
 0x4b6   :  { %v746_v25 = vadd.f32 %v824_v2, %v745_v24  ;;  %v972_v27 = vpop.f32.mrb[9].mxu0 }
 0x4b7   :  { %v748_v28 = vpop.f32.mrb[10].mxu0 }
 0x4b8   :  { %1031 = vtanh.f32 %v746_v25  ;;  %v973_v29 = vpop.f32.mrb[11].mxu0 }
 0x4c2   :  { %v1032_v37 = vpop.eup %1031 }
 0x4c3   :  { %v768_v39 = vmul.f32 %v1032_v37, %v761_v36 }
 0x4c5   :  { %v769_v40 = vadd.f32 %v768_v39, %v767_v38 }
 0x4c7   :  { %770 = vst [vmem:[%s1382_s12] sm:$0x3] %v769_v40 }
 0x4c8   :  { %775 = vsyncpa [#allocation3], 1 }
 0x4c9   :  { %776 = vsyncpa [#allocation7], 1 }
 0x4ca   :  { %777 = vsyncpa [#allocation10], 1 }
 0x4cb   :  { %778 = vsyncpa [#allocation4], 1 }

</bundles_post_ra>
